<compile_context>
chip_gen: v5e
topology: v5e:2x2
jax: 0.10.0
libtpu: 0.0.40
codegen_flags: <defaults>
</compile_context>

<pallas_src>
import functools

import jax
import jax.numpy as jnp
from jax.experimental import pallas as pl
from jax.experimental.pallas import tpu as pltpu

_LANE = 128


def _round_up(n, m):
    return ((n + m - 1) // m) * m


def _fused_attention_kernel(x_ref, w_ref, o_ref, *, scale):
    """x_ref: (B, S, Dp_in) f32; w_ref: (Dp_in, Dp_out) bf16; o_ref: (B, S, Dp_out) f32."""
    B, S, dp_in = x_ref.shape
    dp_out = w_ref.shape[1]

    # In-kernel bf16 cast (hidden under the MXU); reshape merges the leading
    # dims while still f32 (free: each batch is a full 8-row f32 tile).
    x = x_ref[...].reshape(B * S, dp_in).astype(jnp.bfloat16)
    w = w_ref[...]

    # One projection matmul over all B*S rows (q == k == v), f32 accumulation.
    q = jnp.dot(x, w, preferred_element_type=jnp.float32)        # (B*S, Dp_out) f32
    q_bf16 = q.reshape(B, S, dp_out).astype(jnp.bfloat16)        # single bf16 copy

    # Batched scores on the MXU; scale the (B,S,S) scores, not the projection.
    scores = jnp.einsum("bqd,bkd->bqk", q_bf16, q_bf16,
                        preferred_element_type=jnp.float32) * scale

    # Numerically stable softmax, all elementwise math in f32 (VPU/EUP).
    m = jnp.max(scores, axis=-1, keepdims=True)
    p = jnp.exp(scores - m)                                       # un-normalized probs
    denom = jnp.sum(p, axis=-1, keepdims=True)
    r = pl.reciprocal(denom, approx=True)                         # EUP vrcp (free slot)

    # PV matmul on un-normalized bf16 probs; normalize once in f32 afterwards.
    out = jnp.einsum("bqk,bkd->bqd", p.astype(jnp.bfloat16), q_bf16,
                     preferred_element_type=jnp.float32)          # (B, S, Dp_out) f32
    o_ref[...] = (out * r).astype(o_ref.dtype)


def attention_forward(x, w_t):
    """x: (B, S, D_in) float32; w_t: (D_in, D_out) float32 (= nn.Linear weight.T)."""
    B, S, D_in = x.shape
    d_in_w, D_out = w_t.shape
    assert d_in_w == D_in
    scale = 1.0 / (D_in ** 0.5)          # module scales by W.in_features

    # Zero-pad feature dims to lane-dense multiples of 128. Zero padding does
    # not change q@k^T (padded columns contribute 0) nor the valid output
    # columns, which are sliced back out below.
    dp_in = _round_up(D_in, _LANE)
    dp_out = _round_up(D_out, _LANE)

    if dp_in != D_in:
        x = jnp.pad(x, ((0, 0), (0, 0), (0, dp_in - D_in)))        # stays f32
        w_t = jnp.pad(w_t, ((0, dp_in - D_in), (0, 0)))
    if dp_out != D_out:
        w_t = jnp.pad(w_t, ((0, 0), (0, dp_out - D_out)))

    # One-time weight pre-cast (reusable across calls); x is cast in-kernel.
    w_bf16 = w_t.astype(jnp.bfloat16)

    kernel = functools.partial(_fused_attention_kernel, scale=scale)

    out = pl.pallas_call(
        kernel,
        out_shape=jax.ShapeDtypeStruct((B, S, dp_out), x.dtype),
        # Small-shape path: no grid, whole arrays resident in VMEM
        # (no double-buffer allocation, no single-step pipeline overhead).
        in_specs=[
            pl.BlockSpec(memory_space=pltpu.MemorySpace.VMEM),
            pl.BlockSpec(memory_space=pltpu.MemorySpace.VMEM),
        ],
        out_specs=pl.BlockSpec(memory_space=pltpu.MemorySpace.VMEM),
    )(x, w_bf16)

    return out[:, :, :D_out]


def _reference(x, w_t, d_in):
    q = jnp.einsum("bsd,de->bse", x, w_t)
    scores = jnp.einsum("bse,bte->bst", q, q) / (d_in ** 0.5)
    attn = jax.nn.softmax(scores, axis=-1)
    return jnp.einsum("bst,bte->bse", attn, q)


if __name__ == "__main__":
    B, S, D_in, D_out = 2, 8, 32, 32

    key = jax.random.PRNGKey(0)
    kx, kw = jax.random.split(key)
    x = jax.random.normal(kx, (B, S, D_in), dtype=jnp.float32)

    # Deterministic init matching nn.Linear(input_dim, output_dim, bias=False):
    # weight shape (D_out, D_in), uniform(-1/sqrt(D_in), 1/sqrt(D_in)).
    bound = 1.0 / (D_in ** 0.5)
    w = jax.random.uniform(kw, (D_out, D_in), minval=-bound, maxval=bound,
                           dtype=jnp.float32)
    w_t = w.T                                         # (D_in, D_out)

    out = attention_forward(x, w_t)
    out = jax.block_until_ready(out)

    ref = _reference(x, w_t, D_in)
    assert out.shape == (B, S, D_out)
    # bf16 matmul operands (fp32 accumulation, f32 softmax/normalization) ->
    # relaxed tolerance vs the pure-fp32 reference.
    assert jnp.allclose(out, ref, atol=2e-2, rtol=2e-2), (
        float(jnp.max(jnp.abs(out - ref))))

    print("KERNEL_OK")
</pallas_src>

<mosaic_0001>
module attributes {stable_mosaic.version = 11 : i64} {
  func.func @_fused_attention_kernel(%arg0: memref<2x8x128xf32, #tpu.memory_space<vmem>>, %arg1: memref<128x128xbf16, #tpu.memory_space<vmem>>, %arg2: memref<2x8x128xf32, #tpu.memory_space<vmem>>) attributes {dimension_semantics = [], scalar_prefetch = 0 : i64, scratch_operands = 0 : i64, tpu.core_type = #tpu.core_type<tc>} {
    %c0 = arith.constant 0 : index
    %c0_0 = arith.constant 0 : index
    %c0_1 = arith.constant 0 : index
    %0 = vector.load %arg0[%c0, %c0_0, %c0_1] : memref<2x8x128xf32, #tpu.memory_space<vmem>>, vector<2x8x128xf32>
    %1 = vector.shape_cast %0 : vector<2x8x128xf32> to vector<16x128xf32>
    %2 = arith.truncf %1 : vector<16x128xf32> to vector<16x128xbf16>
    %c0_2 = arith.constant 0 : index
    %c0_3 = arith.constant 0 : index
    %3 = vector.load %arg1[%c0_2, %c0_3] : memref<128x128xbf16, #tpu.memory_space<vmem>>, vector<128x128xbf16>
    %cst = arith.constant dense<0.000000e+00> : vector<16x128xf32>
    %4 = tpu.matmul %2, %3, %cst {dimension_numbers = #tpu.dot_dimension_numbers<[1], [0], [0], [1], [0, 0, 1, 1], [], []>} : vector<16x128xbf16>, vector<128x128xbf16>, vector<16x128xf32> -> vector<16x128xf32>
    %5 = vector.shape_cast %4 : vector<16x128xf32> to vector<2x8x128xf32>
    %6 = arith.truncf %5 : vector<2x8x128xf32> to vector<2x8x128xbf16>
    "tpu.trace_start"() <{level = 10 : i32, message = "bqd,bkd->bqk"}> : () -> ()
    %cst_4 = arith.constant dense<0.000000e+00> : vector<2x8x8xf32>
    %7 = tpu.matmul %6, %6, %cst_4 {dimension_numbers = #tpu.dot_dimension_numbers<[2], [2], [1], [1], [0, 0, 0, 1, 1, 1], [0], [0]>} : vector<2x8x128xbf16>, vector<2x8x128xbf16>, vector<2x8x8xf32> -> vector<2x8x8xf32>
    "tpu.trace_stop"() : () -> ()
    %cst_5 = arith.constant 0.176776692 : f32
    %8 = vector.broadcast %cst_5 : f32 to vector<2x8x8xf32>
    %9 = arith.mulf %7, %8 : vector<2x8x8xf32>
    %cst_6 = arith.constant dense<0xFF800000> : vector<2x8xf32>
    %10 = vector.multi_reduction <maximumf>, %9, %cst_6 [2] : vector<2x8x8xf32> to vector<2x8xf32>
    %11 = vector.shape_cast %10 : vector<2x8xf32> to vector<2x8x1xf32>
    %12 = vector.broadcast %11 : vector<2x8x1xf32> to vector<2x8x8xf32>
    %13 = arith.subf %9, %12 : vector<2x8x8xf32>
    %14 = math.exp %13 : vector<2x8x8xf32>
    %cst_7 = arith.constant dense<0.000000e+00> : vector<2x8xf32>
    %15 = vector.multi_reduction <add>, %14, %cst_7 [2] : vector<2x8x8xf32> to vector<2x8xf32>
    %16 = vector.shape_cast %15 : vector<2x8xf32> to vector<2x8x1xf32>
    %17 = tpu.reciprocal %16 {approx = true} : vector<2x8x1xf32> -> vector<2x8x1xf32>
    %18 = arith.truncf %14 : vector<2x8x8xf32> to vector<2x8x8xbf16>
    "tpu.trace_start"() <{level = 10 : i32, message = "bqk,bkd->bqd"}> : () -> ()
    %cst_8 = arith.constant dense<0.000000e+00> : vector<2x8x128xf32>
    %19 = tpu.matmul %18, %6, %cst_8 {dimension_numbers = #tpu.dot_dimension_numbers<[2], [1], [1], [2], [0, 0, 0, 1, 1, 2], [0], [0]>} : vector<2x8x8xbf16>, vector<2x8x128xbf16>, vector<2x8x128xf32> -> vector<2x8x128xf32>
    "tpu.trace_stop"() : () -> ()
    %20 = vector.broadcast %17 : vector<2x8x1xf32> to vector<2x8x128xf32>
    %21 = arith.mulf %19, %20 : vector<2x8x128xf32>
    %c0_9 = arith.constant 0 : index
    %c0_10 = arith.constant 0 : index
    %c0_11 = arith.constant 0 : index
    %22 = vector.load %arg2[%c0_9, %c0_10, %c0_11] : memref<2x8x128xf32, #tpu.memory_space<vmem>>, vector<2x8x128xf32>
    tpu.vector_store %arg2[%c0_9, %c0_10, %c0_11], %21 {strides = array<i32>} : memref<2x8x128xf32, #tpu.memory_space<vmem>>, vector<2x8x128xf32>,
    return
  }
}

</mosaic_0001>

<bundles_post_ra>
// kernel: tpu_custom_call.1
= control target key start
LH: loop header
LB: loop body
LE: loop exit
PB: predicated region body
PF: predicated region fallthrough
CT: control target
= control target key end

     0   :  { %7 = vsyncpa [#allocation3], 0  ;;  %s420_s0 = inlined_call_operand.hbm [shape: f32[2,8,128], index: 0, kind: input, shape index: {}]   ;;  %s421_s1 = inlined_call_operand.hbm [shape: bf16[128,128], index: 1, kind: input, shape index: {}]   ;;  %s422_s2 = inlined_call_operand.hbm [shape: f32[2,8,128], index: 2, kind: output, shape index: {}]  }
   0x1   :  { %8 = vsyncpa [#allocation6], 0 }
   0x2   :  { %9 = vsyncpa [#allocation4], 0  ;;  %s14_s11 = sshll.u32 %s420_s0, 4  ;;  %s377_s12 = smov [#allocation2]   ;;  %s15_s11 = int_to_ptr.hbm [resolvable:$true] %s14_s11 }
   0x3   :  { %s16_s13 = sshll.u32 %s377_s12, 4  ;;  %s27_s16 = sshll.u32 %s421_s1, 4  ;;  %s17_s13 = int_to_ptr.vmem [resolvable:$true] %s16_s13  ;;  %s28_s16 = int_to_ptr.hbm [resolvable:$true] %s27_s16 }
   0x4   :  { %s378_s17 = smov 128   ;;  %s379_s18 = smov 8  }
   0x5   :  { %22 = dma.hbm_to_vmem [thread:$0]  %s15_s11, 256, %s17_s13, [#allocation3], %s378_s17, %s378_s17, %s379_s18  }
   0x6   :  { %s380_s19 = smov [#allocation5]   ;;  %s381_s21 = smov 64  }
   0x7   :  { %s29_s20 = sshll.u32 %s380_s19, 4  ;;  %s382_s0 = smov 4   ;;  %s30_s20 = int_to_ptr.vmem [resolvable:$true] %s29_s20 }
   0x8   :  { %35 = dma.hbm_to_vmem [thread:$0]  %s28_s16, 1024, %s30_s20, [#allocation6], %s381_s21, %s381_s21, %s382_s0  }
   0x9   :  { %371 = dma.done.wait [#allocation3], 256  }
   0xa   :  { %372 = vsyncadd [#allocation3], 4294967040 }
   0xb   :  { %373 = dma.done.wait [#allocation6], 1024  }
   0xc   :  { %374 = vsyncadd [#allocation6], 4294966272  ;;  %v283_v0 = vld [vmem:[#allocation5 + $0x38] sm:$0xff]  ;;  %v282_v1 = vld [vmem:[#allocation5 + $0x30] sm:$0xff]  ;;  %vm182_vm0 = vcmask 1043456   ;;  %vm156_vm1 = vcmask 64512  }
   0xd   :  { %112 = vmatpush.bf16.msra.mxu0 %v283_v0  ;;  %v281_v2 = vld [vmem:[#allocation5 + $0x28] sm:$0xff]  ;;  %v280_v3 = vld [vmem:[#allocation5 + $0x20] sm:$0xff]  ;;  %v279_v4 = vld [vmem:[#allocation5 + $0x18] sm:$0xff]  ;;  %s383_s1 = smov [#allocation7]   ;;  %s228_s25 = sshll.u32 %s422_s2, 4  ;;  %s229_s25 = int_to_ptr.hbm [resolvable:$true] %s228_s25 }
   0xe   :  { %v278_v5 = vld [vmem:[#allocation5 + $0x10] sm:$0xff]  ;;  %v277_v6 = vld [vmem:[#allocation5 + $0x8] sm:$0xff]  ;;  %v276_v7 = vld [vmem:[#allocation5] sm:$0xff]  ;;  %s226_s22 = sshll.u32 %s383_s1, 4  ;;  %s227_s22 = int_to_ptr.vmem [resolvable:$true] %s226_s22 }
   0xf   :  { %v45_v8 = vld [vmem:[#allocation2] sm:$0xff]  ;;  %v46_v9 = vld [vmem:[#allocation2 + $0x8] sm:$0xff] }
  0x10   :  { %v47_v10 = vpack.c.bf16 %v46_v9, %v45_v8 }
  0x11   :  { %113 = vmatpush.bf16.msra.mxu0 %v282_v1 }
  0x15   :  { %114 = vmatpush.bf16.msra.mxu0 %v281_v2 }
  0x19   :  { %115 = vmatpush.bf16.msra.mxu0 %v280_v3 }
  0x1d   :  { %116 = vmatpush.bf16.msra.mxu0 %v279_v4 }
  0x21   :  { %117 = vmatpush.bf16.msra.mxu0 %v278_v5 }
  0x25   :  { %118 = vmatpush.bf16.msra.mxu0 %v277_v6 }
  0x29   :  { %119 = vmatpush.bf16.msra.mxu0 %v276_v7 }
  0x2c   :  { %120 = vmatmul.bf16.vlgmr.msra.gmra.mxu0 %v47_v10 }
  0xa9   :  { %v121_v11 = vpop.f32.mrf.mxu0 }
  0xaa   :  { %v126_v12 = vpack.c.bf16 %v121_v11, %v121_v11 }
  0xac   :  { %135 = vmatpush.bf16.xpose.msra.mxu1 %v126_v12  ;;  %v184_v13 = vsel %vm182_vm0, %v126_v12, 0 }
  0xad   :  { %193 = vmatpush.bf16.msra.mxu3 %v184_v13 }
  0xb1   :  { %v123_v14 = vpop.f32.mrf.mxu0 }
  0xb2   :  { %v127_v15 = vpack.c.bf16 %v123_v14, %v123_v14 }
  0xb3   :  { %136 = vmatmul.bf16.vlgmr.msra.gmra.mxu1 %v126_v12 }
  0xb4   :  { %148 = vmatpush.bf16.xpose.msra.mxu2 %v127_v15  ;;  %v203_v16 = vsel %vm182_vm0, %v127_v15, 0 }
  0xb5   :  { %212 = vmatpush.bf16.msrb.mxu3 %v203_v16 }
  0xbb   :  { %149 = vmatmul.bf16.vlgmr.msra.gmra.mxu2 %v127_v15 }
 0x130   :  { %v137_v17 = vpop.f32.mrf.mxu1 }
 0x131   :  { %v154_v18 = vmul.f32 0.17677669, %v137_v17 }
 0x133   :  { %v157_v19 = vsel %vm156_vm1, %v154_v18, -inf }
 0x134   :  { %158 = vmax.xlane.f32.xlu0 %v157_v19 }
 0x138   :  { %v139_v20 = vpop.f32.mrf.mxu1 }
 0x13e   :  { %v150_v21 = vpop.f32.mrf.mxu2 }
 0x13f   :  { %v155_v22 = vmul.f32 0.17677669, %v150_v21 }
 0x141   :  { %v160_v23 = vsel %vm156_vm1, %v155_v22, -inf }
 0x142   :  { %161 = vmax.xlane.f32.xlu0 %v160_v23 }
 0x146   :  { %v152_v24 = vpop.f32.mrf.mxu2 }
 0x1a7   :  { %v159_v25 = vpop.xlane.xlu0 %158 }
 0x1a8   :  { %v163_v26 = vsub.f32 %v154_v18, %v159_v25 }
 0x1aa   :  { %v165_v27 = vmul.f32 1.442695, %v163_v26 }
 0x1ac   :  { %291 = vpow2.f32 %v165_v27 }
 0x1b2   :  { %v292_v28 = vpop.eup %291 }
 0x1b3   :  { %v169_v29 = vsel %vm156_vm1, %v292_v28, 0.0  ;;  %v177_v30 = vpack.c.bf16 %v292_v28, %v292_v28 }
 0x1b4   :  { %170 = vadd.xlane.f32.xlu1 %v169_v29 }
 0x1b5   :  { %274 = vmatmul.msk.bf16.vlgmr.msra.gmra.mxu3 %vm156_vm1, %v177_v30  ;;  %v162_v31 = vpop.xlane.xlu0 %161 }
 0x1b6   :  { %v164_v32 = vsub.f32 %v155_v22, %v162_v31 }
 0x1b8   :  { %v167_v33 = vmul.f32 1.442695, %v164_v32 }
 0x1ba   :  { %293 = vpow2.f32 %v167_v33 }
 0x1c0   :  { %v294_v34 = vpop.eup %293 }
 0x1c1   :  { %v172_v35 = vsel %vm156_vm1, %v294_v34, 0.0  ;;  %v178_v36 = vpack.c.bf16 %v294_v34, %v294_v34 }
 0x1c2   :  { %173 = vadd.xlane.f32.xlu1 %v172_v35 }
 0x1c5   :  { %275 = vmatmul.msk.bf16.vlgmr.msrb.gmra.mxu3 %vm156_vm1, %v178_v36 }
 0x227   :  { %v171_v37 = vpop.xlane.xlu1 %170 }
 0x228   :  { %295 = vrcp.f32 %v171_v37 }
 0x22e   :  { %v296_v38 = vpop.eup %295 }
 0x235   :  { %v174_v41 = vpop.xlane.xlu1 %173 }
 0x236   :  { %297 = vrcp.f32 %v174_v41 }
 0x238   :  { %v195_v39 = vpop.f32.mrf.mxu3 }
 0x239   :  { %v218_v40 = vmul.f32 %v296_v38, %v195_v39 }
 0x23b   :  { %220 = vst [vmem:[#allocation7] sm:$0xff] %v218_v40 }
 0x23c   :  { %v298_v43 = vpop.eup %297 }
 0x240   :  { %v197_v42 = vpop.f32.mrf.mxu3 }
 0x248   :  { %v214_v44 = vpop.f32.mrf.mxu3 }
 0x249   :  { %v219_v45 = vmul.f32 %v298_v43, %v214_v44 }
 0x24b   :  { %221 = vst [vmem:[#allocation7 + $0x8] sm:$0xff] %v219_v45 }
 0x24c   :  { %234 = dma.vmem_to_hbm [thread:$0]  %s227_s22, 256, %s229_s25, [#allocation4], %s378_s17, %s378_s17, %s379_s18  }
 0x250   :  { %v216_v46 = vpop.f32.mrf.mxu3 }
 0x251   :  { %375 = dma.done.wait [#allocation4], 256  }
 0x252   :  { %376 = vsyncadd [#allocation4], 4294967040 }
 0x253   :  { %239 = vsyncpa [#allocation3], 1 }
 0x254   :  { %240 = vsyncpa [#allocation6], 1 }
 0x255   :  { %241 = vsyncpa [#allocation4], 1 }

</bundles_post_ra>
